<compile_context>
chip_gen: v7x
topology: tpu7x:2x2x1
jax: 0.10.0
libtpu: 0.0.40
codegen_flags: <defaults>
</compile_context>

<pallas_src>
import functools

import jax
import jax.numpy as jnp
from jax.experimental import pallas as pl
from jax.experimental.pallas import tpu as pltpu


def _roll(x, shift, axis):
    """pltpu.roll (single XLU rotate) with the shift canonicalized to >= 0."""
    return pltpu.roll(x, shift % x.shape[axis], axis)


def _gray_scott_kernel(y_ref, dy_ref, *, N, cu, cv, f, fk):
    """One block: y_ref / dy_ref are (R, D) with rows [u0, v0, u1, v1, ...]."""
    y = y_ref[...]                                    # (R, D)
    R, D = y.shape

    # Circular 5-point Laplacian on the flattened field (unscaled by 1/h^2):
    #   * row (H) neighbours are exactly flat rolls by +/-N,
    #   * column (W) neighbours are flat rolls by +/-1 except at the row edges,
    #     where the circular wrap must stay inside the row -> (1, D) lane mask.
    up = _roll(y, N, 1)                               # x[i-1, j]
    down = _roll(y, -N, 1)                            # x[i+1, j]
    col = jax.lax.broadcasted_iota(jnp.int32, (1, D), 1) % N
    left = jnp.where(col == 0, _roll(y, -(N - 1), 1), _roll(y, 1, 1))
    right = jnp.where(col == N - 1, _roll(y, N - 1, 1), _roll(y, -1, 1))
    lap = up + down + left + right - 4.0 * y          # (R, D)

    # Pair each u row (even) with its v row (odd) via sublane rolls.  Even rows
    # only read the row below (never wraps inside a block) and odd rows only
    # read the row above (never wraps), so the circular wrap is harmless.
    y_dn = _roll(y, -1, 0)                            # even row i -> v at i+1
    y_up = _roll(y, 1, 0)                             # odd  row i -> u at i-1
    row = jax.lax.broadcasted_iota(jnp.int32, (R, 1), 0)
    is_u = (row % 2) == 0                             # (R, 1) parity mask

    # du = (Du/h^2)*lap - u*v^2 + f - f*u   (even rows: y = u, y_dn = v)
    # dv = (Dv/h^2)*lap + u*v^2 - (f+k)*v   (odd rows:  y = v, y_up = u)
    coef = jnp.where(is_u, cu, cv)                    # (R, 1), D*/h^2 folded
    react_u = f - f * y - y * y_dn * y_dn
    react_v = y_up * y * y - fk * y
    dy_ref[...] = (coef * lap + jnp.where(is_u, react_u, react_v)).astype(dy_ref.dtype)


def _num_tensorcores():
    try:
        return max(1, int(getattr(jax.devices()[0], "num_cores", 1)))
    except Exception:  # pragma: no cover - heuristic only
        return 1


def _choose_rows_per_block(R_total, D, itemsize, target_tile_bytes=2 * 1024 * 1024):
    """Rows per block R for the (R, D) y tile.

    Prefers a divisor of R_total that is a multiple of 8 (dense sublanes, no
    padding), capped at ~2 MiB per tile: with double-buffered in + out plus
    ~8 block-sized temporaries that is ~24 MiB of VMEM, safely under the
    48 MiB vmem_limit (and v7x's 64 MiB physical VMEM).  Returns
    (rows_per_block, padded_total_rows); padded_total_rows == R_total on the
    normal (copy-free) paths.
    """
    row_bytes = D * itemsize
    max_rows = max(8, int(target_tile_bytes // row_bytes))

    best = None
    r = 8
    while r <= min(R_total, max_rows):
        if R_total % r == 0:
            best = r
        r += 8

    if best is not None:
        # On a 2-TensorCore chip (v7x) keep >= 2 grid steps so the "parallel"
        # batch axis can actually be sharded; on 1-TC chips take the biggest tile.
        if _num_tensorcores() >= 2 and R_total // best < 2:
            r = best - 8
            while r >= 8:
                if R_total % r == 0:
                    return r, R_total
                r -= 8
        return best, R_total

    if R_total * row_bytes <= 4 * target_tile_bytes:
        # Small batch with no multiple-of-8 divisor: take the whole array as a
        # single block (block_shape == array shape, so the (8,128) rule is waived).
        return R_total, R_total

    # Rare corner (no suitable divisor and array too big for one block):
    # fall back to padding the row axis (costs one extra HBM pass).
    r = (max_rows // 8) * 8
    r_pad = pl.cdiv(R_total, r) * r
    return r, r_pad


def gray_scott_forward(t, y, *, N, L=2.0, Du=1e-5, Dv=5e-6, f=0.04, k=0.06,
                       rows_per_block=None):
    """Pallas implementation of GrayScott.forward: y (M, 2, N*N) -> dy/dt (M, 2, N*N)."""
    del t  # autonomous system (t is unused in the PyTorch forward as well)
    M, C, D = y.shape
    assert C == 2 and D == N * N and N >= 2

    inv_h2 = (float(N) / float(L)) ** 2
    itemsize = jnp.dtype(y.dtype).itemsize

    # Free, contiguous reshape: rows alternate [u_m, v_m]; lane axis = full field.
    R_total = 2 * M
    y2 = y.reshape(R_total, D)

    if rows_per_block is None:
        R, R_pad = _choose_rows_per_block(R_total, D, itemsize)
    else:
        R = int(rows_per_block)
        R_pad = pl.cdiv(R_total, R) * R
    assert R % 2 == 0, "rows_per_block must keep (u, v) row pairs together"

    if R_pad != R_total:  # rare fallback; normal paths are copy-free
        y2 = jnp.pad(y2, ((0, R_pad - R_total), (0, 0)))
    G = R_pad // R

    kernel = functools.partial(
        _gray_scott_kernel, N=N, cu=float(Du) * inv_h2, cv=float(Dv) * inv_h2,
        f=float(f), fk=float(f) + float(k))

    out = pl.pallas_call(
        kernel,
        out_shape=jax.ShapeDtypeStruct((R_pad, D), y.dtype),
        grid=(G,),
        in_specs=[pl.BlockSpec((R, D), lambda g: (g, 0))],
        out_specs=pl.BlockSpec((R, D), lambda g: (g, 0)),
        compiler_params=pltpu.CompilerParams(
            dimension_semantics=("parallel",),
            vmem_limit_bytes=48 * 1024 * 1024),
        cost_estimate=pl.CostEstimate(
            flops=20 * R_pad * D, transcendentals=0,
            bytes_accessed=2 * R_pad * D * itemsize),
    )(y2)

    if R_pad != R_total:
        out = out[:R_total]
    return out.reshape(M, 2, D)


def gray_scott_reference(t, y, *, N, L=2.0, Du=1e-5, Dv=5e-6, f=0.04, k=0.06):
    """Pure-JAX reference matching the PyTorch forward (circular conv == rolls)."""
    del t
    M = y.shape[0]
    y4 = y.reshape(M, 2, N, N)
    u, v = y4[:, 0], y4[:, 1]
    inv_h2 = (float(N) / float(L)) ** 2

    def lap(x):
        return inv_h2 * (jnp.roll(x, 1, -1) + jnp.roll(x, -1, -1)
                         + jnp.roll(x, 1, -2) + jnp.roll(x, -1, -2) - 4.0 * x)

    uvv = u * v * v
    du = Du * lap(u) - uvv + f * (1.0 - u)
    dv = Dv * lap(v) + uvv - (f + k) * v
    return jnp.stack([du, dv], axis=1).reshape(M, 2, N * N)


if __name__ == "__main__":
    L, Du, Dv, f, k = 2.0, 1e-5, 5e-6, 0.04, 0.06
    key = jax.random.PRNGKey(0)

    def make_state(key, M, N):
        # init_state analogue: u=1, v=0 except on random "blobs" (u=0.5, v=0.25)
        mask = jax.random.bernoulli(key, p=0.5, shape=(M, N, N))
        u0 = jnp.where(mask, 0.5, 1.0).astype(jnp.float32)
        v0 = jnp.where(mask, 0.25, 0.0).astype(jnp.float32)
        return jnp.stack([u0, v0], axis=1).reshape(M, 2, N * N)

    t = jnp.zeros((1,), dtype=jnp.float32)
    k1, k2 = jax.random.split(key)

    # Case 1: M=2, N=16 -> single (4, 256) block, no padding, no extra copies.
    y_a = make_state(k1, 2, 16)
    dy_a = jax.block_until_ready(
        gray_scott_forward(t, y_a, N=16, L=L, Du=Du, Dv=Dv, f=f, k=k))
    ref_a = gray_scott_reference(t, y_a, N=16, L=L, Du=Du, Dv=Dv, f=f, k=k)
    assert dy_a.shape == y_a.shape
    assert jnp.allclose(dy_a, ref_a, rtol=1e-4, atol=1e-5), "mismatch (M=2, N=16)"

    # Case 2: M=8, N=16 with explicit 8-row blocks -> multi-step grid path.
    y_b = make_state(k2, 8, 16)
    dy_b = jax.block_until_ready(
        gray_scott_forward(t, y_b, N=16, L=L, Du=Du, Dv=Dv, f=f, k=k,
                           rows_per_block=8))
    ref_b = gray_scott_reference(t, y_b, N=16, L=L, Du=Du, Dv=Dv, f=f, k=k)
    assert jnp.allclose(dy_b, ref_b, rtol=1e-4, atol=1e-5), "mismatch (M=8, N=16)"

    print("KERNEL_OK")
</pallas_src>

<mosaic_0001>
module attributes {stable_mosaic.version = 11 : i64} {
  func.func @_gray_scott_kernel(%arg0: i32, %arg1: memref<4x256xf32, #tpu.memory_space<vmem>>, %arg2: memref<4x256xf32, #tpu.memory_space<vmem>>) attributes {dimension_semantics = [#tpu.dimension_semantics<parallel>], iteration_bounds = array<i64: 1>, scalar_prefetch = 0 : i64, scratch_operands = 0 : i64, tpu.core_type = #tpu.core_type<tc>, window_params = [{transform_indices = @transform_0, window_bounds = array<i64: 4, 256>}, {transform_indices = @transform_1, window_bounds = array<i64: 4, 256>}]} {
    %c0 = arith.constant 0 : index
    %c0_0 = arith.constant 0 : index
    %0 = vector.load %arg1[%c0, %c0_0] : memref<4x256xf32, #tpu.memory_space<vmem>>, vector<4x256xf32>
    %c16_i32 = arith.constant 16 : i32
    %1 = tpu.dynamic_rotate %0 by %c16_i32 dim 1 : vector<4x256xf32>, i32 -> vector<4x256xf32>
    %c240_i32 = arith.constant 240 : i32
    %2 = tpu.dynamic_rotate %0 by %c240_i32 dim 1 : vector<4x256xf32>, i32 -> vector<4x256xf32>
    %3 = tpu.iota {dimensions = array<i32: 1>} : vector<1x256xi32>
    %c16_i32_1 = arith.constant 16 : i32
    %c0_i32 = arith.constant 0 : i32
    %4 = arith.cmpi eq, %c16_i32_1, %c0_i32 : i32
    %c1_i32 = arith.constant 1 : i32
    %5 = arith.select %4, %c1_i32, %c16_i32_1 : i32
    %6 = vector.broadcast %5 : i32 to vector<1x256xi32>
    %7 = arith.remsi %3, %6 : vector<1x256xi32>
    %c0_i32_2 = arith.constant 0 : i32
    %8 = vector.broadcast %c0_i32_2 : i32 to vector<1x256xi32>
    %9 = arith.cmpi ne, %7, %8 : vector<1x256xi32>
    %c0_i32_3 = arith.constant 0 : i32
    %10 = vector.broadcast %c0_i32_3 : i32 to vector<1x256xi32>
    %11 = arith.cmpi slt, %7, %10 : vector<1x256xi32>
    %c0_i32_4 = arith.constant 0 : i32
    %12 = arith.cmpi slt, %5, %c0_i32_4 : i32
    %13 = vector.broadcast %12 : i1 to vector<1x256xi1>
    %14 = vector.broadcast %13 : vector<1x256xi1> to vector<1x256xi1>
    %15 = arith.xori %11, %14 : vector<1x256xi1>
    %16 = arith.andi %15, %9 : vector<1x256xi1>
    %17 = vector.broadcast %5 : i32 to vector<1x256xi32>
    %18 = arith.addi %7, %17 : vector<1x256xi32>
    %19 = arith.select %16, %18, %7 : vector<1x256xi1>, vector<1x256xi32>
    %c0_i32_5 = arith.constant 0 : i32
    %20 = vector.broadcast %c0_i32_5 : i32 to vector<1x256xi32>
    %21 = arith.cmpi eq, %19, %20 : vector<1x256xi32>
    %c241_i32 = arith.constant 241 : i32
    %22 = tpu.dynamic_rotate %0 by %c241_i32 dim 1 : vector<4x256xf32>, i32 -> vector<4x256xf32>
    %c1_i32_6 = arith.constant 1 : i32
    %23 = tpu.dynamic_rotate %0 by %c1_i32_6 dim 1 : vector<4x256xf32>, i32 -> vector<4x256xf32>
    %24 = vector.shape_cast %21 : vector<1x256xi1> to vector<1x256xi1>
    %25 = vector.broadcast %24 : vector<1x256xi1> to vector<4x256xi1>
    %26 = arith.select %25, %22, %23 : vector<4x256xi1>, vector<4x256xf32>
    %c15_i32 = arith.constant 15 : i32
    %27 = vector.broadcast %c15_i32 : i32 to vector<1x256xi32>
    %28 = arith.cmpi eq, %19, %27 : vector<1x256xi32>
    %c15_i32_7 = arith.constant 15 : i32
    %29 = tpu.dynamic_rotate %0 by %c15_i32_7 dim 1 : vector<4x256xf32>, i32 -> vector<4x256xf32>
    %c255_i32 = arith.constant 255 : i32
    %30 = tpu.dynamic_rotate %0 by %c255_i32 dim 1 : vector<4x256xf32>, i32 -> vector<4x256xf32>
    %31 = vector.shape_cast %28 : vector<1x256xi1> to vector<1x256xi1>
    %32 = vector.broadcast %31 : vector<1x256xi1> to vector<4x256xi1>
    %33 = arith.select %32, %29, %30 : vector<4x256xi1>, vector<4x256xf32>
    %34 = arith.addf %1, %2 : vector<4x256xf32>
    %35 = arith.addf %34, %26 : vector<4x256xf32>
    %36 = arith.addf %35, %33 : vector<4x256xf32>
    %cst = arith.constant 4.000000e+00 : f32
    %37 = vector.broadcast %cst : f32 to vector<4x256xf32>
    %38 = arith.mulf %37, %0 : vector<4x256xf32>
    %39 = arith.subf %36, %38 : vector<4x256xf32>
    %c3_i32 = arith.constant 3 : i32
    %40 = tpu.dynamic_rotate %0 by %c3_i32 dim 0 : vector<4x256xf32>, i32 -> vector<4x256xf32>
    %c1_i32_8 = arith.constant 1 : i32
    %41 = tpu.dynamic_rotate %0 by %c1_i32_8 dim 0 : vector<4x256xf32>, i32 -> vector<4x256xf32>
    %42 = tpu.iota {dimensions = array<i32: 0>} : vector<4x1xi32>
    %c2_i32 = arith.constant 2 : i32
    %c0_i32_9 = arith.constant 0 : i32
    %43 = arith.cmpi eq, %c2_i32, %c0_i32_9 : i32
    %c1_i32_10 = arith.constant 1 : i32
    %44 = arith.select %43, %c1_i32_10, %c2_i32 : i32
    %45 = vector.broadcast %44 : i32 to vector<4x1xi32>
    %46 = arith.remsi %42, %45 : vector<4x1xi32>
    %c0_i32_11 = arith.constant 0 : i32
    %47 = vector.broadcast %c0_i32_11 : i32 to vector<4x1xi32>
    %48 = arith.cmpi ne, %46, %47 : vector<4x1xi32>
    %c0_i32_12 = arith.constant 0 : i32
    %49 = vector.broadcast %c0_i32_12 : i32 to vector<4x1xi32>
    %50 = arith.cmpi slt, %46, %49 : vector<4x1xi32>
    %c0_i32_13 = arith.constant 0 : i32
    %51 = arith.cmpi slt, %44, %c0_i32_13 : i32
    %52 = vector.broadcast %51 : i1 to vector<4x1xi1>
    %53 = vector.broadcast %52 : vector<4x1xi1> to vector<4x1xi1>
    %54 = arith.xori %50, %53 : vector<4x1xi1>
    %55 = arith.andi %54, %48 : vector<4x1xi1>
    %56 = vector.broadcast %44 : i32 to vector<4x1xi32>
    %57 = arith.addi %46, %56 : vector<4x1xi32>
    %58 = arith.select %55, %57, %46 : vector<4x1xi1>, vector<4x1xi32>
    %c0_i32_14 = arith.constant 0 : i32
    %59 = vector.broadcast %c0_i32_14 : i32 to vector<4x1xi32>
    %60 = arith.cmpi eq, %58, %59 : vector<4x1xi32>
    %cst_15 = arith.constant 6.400000e-04 : f32
    %cst_16 = arith.constant 3.200000e-04 : f32
    %61 = vector.broadcast %cst_15 : f32 to vector<4x1xf32>
    %62 = vector.broadcast %cst_16 : f32 to vector<4x1xf32>
    %63 = arith.select %60, %61, %62 : vector<4x1xi1>, vector<4x1xf32>
    %cst_17 = arith.constant 4.000000e-02 : f32
    %64 = vector.broadcast %cst_17 : f32 to vector<4x256xf32>
    %65 = arith.mulf %64, %0 : vector<4x256xf32>
    %cst_18 = arith.constant 4.000000e-02 : f32
    %66 = vector.broadcast %cst_18 : f32 to vector<4x256xf32>
    %67 = arith.subf %66, %65 : vector<4x256xf32>
    %68 = arith.mulf %0, %40 : vector<4x256xf32>
    %69 = arith.mulf %68, %40 : vector<4x256xf32>
    %70 = arith.subf %67, %69 : vector<4x256xf32>
    %71 = arith.mulf %41, %0 : vector<4x256xf32>
    %72 = arith.mulf %71, %0 : vector<4x256xf32>
    %cst_19 = arith.constant 1.000000e-01 : f32
    %73 = vector.broadcast %cst_19 : f32 to vector<4x256xf32>
    %74 = arith.mulf %73, %0 : vector<4x256xf32>
    %75 = arith.subf %72, %74 : vector<4x256xf32>
    %76 = vector.broadcast %63 : vector<4x1xf32> to vector<4x256xf32>
    %77 = arith.mulf %76, %39 : vector<4x256xf32>
    %78 = vector.shape_cast %60 : vector<4x1xi1> to vector<4x1xi1>
    %79 = vector.broadcast %78 : vector<4x1xi1> to vector<4x256xi1>
    %80 = arith.select %79, %70, %75 : vector<4x256xi1>, vector<4x256xf32>
    %81 = arith.addf %77, %80 : vector<4x256xf32>
    %c0_20 = arith.constant 0 : index
    %c0_21 = arith.constant 0 : index
    %82 = vector.load %arg2[%c0_20, %c0_21] : memref<4x256xf32, #tpu.memory_space<vmem>>, vector<4x256xf32>
    tpu.vector_store %arg2[%c0_20, %c0_21], %81 {strides = array<i32>} : memref<4x256xf32, #tpu.memory_space<vmem>>, vector<4x256xf32>,
    return
  }
  func.func @transform_0(%arg0: i32) -> (i32, i32) {
    %c0_i32 = arith.constant 0 : i32
    %c0_i32_0 = arith.constant 0 : i32
    return %arg0, %c0_i32 : i32, i32
  }
  func.func @transform_1(%arg0: i32) -> (i32, i32) {
    %c0_i32 = arith.constant 0 : i32
    %c0_i32_0 = arith.constant 0 : i32
    return %arg0, %c0_i32 : i32, i32
  }
}

</mosaic_0001>

<bundles_post_ra>
// kernel: tpu_custom_call.1
= control target key start
LH: loop header
LB: loop body
LE: loop exit
PB: predicated region body
PF: predicated region fallthrough
CT: control target
= control target key end

     0   :  { %6 = vsyncpa [#allocation3], 0  ;;  %s365_s0 = inlined_call_operand.hbm [shape: f32[4,256], index: 0, kind: input, shape index: {}]   ;;  %s366_s1 = inlined_call_operand.hbm [shape: f32[4,256], index: 1, kind: output, shape index: {}]  }
   0x1   :  { %7 = vsyncpa [#allocation4], 0  ;;  %s278_s6 = smov [#allocation2]   ;;  %s230_s10 = scalar_lea.hbm %s365_s0, 128 }
   0x2   :  { %s14_s7 = sshll.u32 %s278_s6, 4  ;;  %p231_p0 = scmp.ne.s32.totalorder %s365_s0, %s230_s10  ;;  %s15_s7 = int_to_ptr.vmem [resolvable:$true] %s14_s7 }
   0x3   :  { %p234_p1 = scmp.lt.u32.totalorder %s230_s10, %s365_s0 }
   0x5   :  { %p236_p2 = pnand %p234_p1, %p231_p0 }
   0x7   :  { %239 = shalt.err (!%p236_p2)
}
   0x8   :  { %s240_s15 = scalar_lea.vmem %s15_s7, 128  ;;  %p245_p4 = scmp.lt.s32.totalorder %s15_s7, %s15_s7 }
   0x9   :  { %p241_p3 = scmp.ne.s32.totalorder %s15_s7, %s240_s15  ;;  %p246_p5 = scmp.lt.s32.totalorder %s240_s15, %s240_s15 }
   0xb   :  { %p247_p6 = por %p246_p5, %p245_p4 }
   0xd   :  { %p248_p7 = pnand %p247_p6, %p241_p3 }
   0xf   :  { %251 = shalt.err (!%p248_p7)
}
  0x10   :  { %17 = dma.hbm_to_vmem [thread:$0]  %s365_s0, 128, %s15_s7, [#allocation3]  }
  0x11   :  { %274 = dma.done.wait [#allocation3], 128  }
  0x12   :  { %275 = vsyncadd [#allocation3], 4294967168  ;;  %v309_v0 = vld [vmem:[#allocation2] sm:$0xff]  ;;  %vm122_vm0 = vcmask 1047556   ;;  %s279_s18 = smov 112   ;;  %s280_s19 = smov 16   ;;  %v29_v9 = vlaneseq }
  0x13   :  { %34 = vrot.lane.b32.xlu1 %v309_v0, %s279_s18  ;;  %25 = vrot.lane.b32.xlu0 %v309_v0, %s280_s19  ;;  %v23_v1 = vcombine.high %v309_v0, %v309_v0  ;;  %v123_v2 = vrot.slane %v309_v0, 4  ;;  %s281_s0 = smov 113   ;;  %v164_v5 = vrot.slane %v309_v0, 5  ;;  %vm153_vm1 = vcmask 1042432   ;;  %s282_s20 = smov 1  }
  0x14   :  { %vm154_vm2 = vcmask 1046532   ;;  %v172_v8 = vmul.f32 0.1, %v309_v0  ;;  %v147_v12 = vmul.f32 0.04, %v309_v0  ;;  %v132_v16 = vshrl.u32 %v29_v9, 7 }
  0x15   :  { %v124_v3 = vsel %vm122_vm0, %v123_v2, %v309_v0  ;;  %v165_v6 = vrot.slane %v23_v1, 5  ;;  %vm155_vm3 = vmor %vm153_vm1, %vm154_vm2  ;;  %s283_s21 = smov 15   ;;  %s284_s22 = smov 127   ;;  %v30_v40 = vand.u32 127, %v29_v9  ;;  %v116_v59 = vmul.f32 4.0, %v309_v0 }
  0x16   :  { %v127_v4 = vrot.slane %v124_v3, 4  ;;  %v175_v15 = vrot.slane %v172_v8, 5  ;;  %v174_v21 = vcombine.high %v172_v8, %v172_v8  ;;  %v148_v23 = vsub.f32 0.04, %v147_v12  ;;  %s286_s23 = smov [#allocation5]  }
  0x17   :  { %68 = vrot.lane.b32.xlu0 %v309_v0, %s281_s0  ;;  %36 = vrot.lane.b32.xlu1 %v23_v1, %s279_s18  ;;  %v169_v14 = vmul.f32 %v165_v6, %v23_v1  ;;  %v137_v27 = vand.u32 1, %v132_v16  ;;  %v41_v42 = vadd.s32 128, %v30_v40  ;;  %v46_v45 = vand.u32 15, %v30_v40  ;;  %s209_s24 = sshll.u32 %s286_s23, 4  ;;  %s210_s24 = int_to_ptr.vmem [resolvable:$true] %s209_s24 }
  0x18   :  { %v129_v7 = vsel %vm122_vm0, %v127_v4, %v309_v0  ;;  %v176_v25 = vrot.slane %v174_v21, 5  ;;  %vm79_vm5 = vcmp.lt.s32.totalorder %v30_v40, 1  ;;  %vm31_vm6 = vcmp.lt.s32.totalorder %v30_v40, 16  ;;  %s252_s25 = scalar_lea.vmem %s210_s24, 128  ;;  %p257_p9 = scmp.lt.s32.totalorder %s210_s24, %s210_s24 }
  0x19   :  { %v151_v10 = vcombine.low %v129_v7, %v23_v1  ;;  %v218_v11 = vcombine.high %v129_v7, %v309_v0  ;;  %v168_v13 = vmul.f32 %v164_v5, %v129_v7  ;;  %v171_v20 = vmul.f32 %v169_v14, %v165_v6  ;;  %p253_p8 = scmp.ne.s32.totalorder %s210_s24, %s252_s25  ;;  %p258_p10 = scmp.lt.s32.totalorder %s252_s25, %s252_s25 }
  0x1a   :  { %vm326_vm4 = vcmp.eq.s32.totalorder %v137_v27, 0  ;;  %v53_v46 = vand.u32 15, %v41_v42  ;;  %vm38_vm7 = vcmp.lt.s32.totalorder %v30_v40, 112  ;;  %vm72_vm8 = vcmp.lt.s32.totalorder %v30_v40, 113 }
  0x1b   :  { %70 = vrot.lane.b32.xlu1 %v23_v1, %s281_s0  ;;  %27 = vrot.lane.b32.xlu0 %v23_v1, %s280_s19  ;;  %v219_v17 = vrot.slane %v151_v10, 9  ;;  %v158_v18 = vrot.slane %v218_v11, 5  ;;  %v170_v19 = vmul.f32 %v168_v13, %v164_v5  ;;  %v180_v29 = vsub.f32 %v171_v20, %v176_v25  ;;  %p259_p11 = por %p258_p10, %p257_p9 }
  0x1c   :  { %vm337_vm9 = vcmp.eq.s32.totalorder %v46_v45, 0  ;;  %vm341_vm10 = vcmp.eq.s32.totalorder %v53_v46, 0  ;;  %vm94_vm11 = vcmp.lt.s32.totalorder %v30_v40, 15  ;;  %vm101_vm12 = vcmp.lt.s32.totalorder %v30_v40, 127 }
  0x1d   :  { %v159_v22 = vsel %vm155_vm3, %v219_v17, %v158_v18  ;;  %v179_v26 = vsub.f32 %v170_v19, %v175_v15  ;;  %v191_v32 = vrot.slane %v180_v29, 3  ;;  %vm88_vm13 = vcmp.eq.s32.totalorder %v46_v45, 15  ;;  %p260_p12 = pnand %p259_p11, %p253_p8 }
  0x1e   :  { %v161_v24 = vmul.f32 %v159_v22, %v309_v0  ;;  %vm89_vm14 = vcmp.eq.s32.totalorder %v53_v46, 15  ;;  %v118_v6 = vcombine.high %v116_v59, %v116_v59  ;;  %v285_v15 = vmov 0.00032  }
  0x1f   :  { %77 = vrot.lane.b32.xlu1 %v23_v1, %s282_s20  ;;  %75 = vrot.lane.b32.xlu0 %v309_v0, %s282_s20  ;;  %v190_v30 = vrot.slane %v179_v26, 3  ;;  %v146_v16 = vsel %vm326_vm4, 0.00064, %v285_v15 }
  0x20   :  { %v162_v28 = vmul.f32 %v161_v24, %v159_v22 }
  0x22   :  { %v163_v31 = vsub.f32 %v148_v23, %v162_v28 }
  0x23   :  { %92 = vrot.lane.b32.xlu1 %v23_v1, %s283_s21  ;;  %90 = vrot.lane.b32.xlu0 %v309_v0, %s283_s21 }
  0x24   :  { %v186_v34 = vcombine.high %v163_v31, %v163_v31  ;;  %v332_v35 = vsel %vm326_vm4, %v163_v31, %v190_v30 }
  0x26   :  { %v195_v36 = vsel %vm326_vm4, %v186_v34, %v191_v32 }
  0x27   :  { %99 = vrot.lane.b32.xlu1 %v23_v1, %s284_s22  ;;  %97 = vrot.lane.b32.xlu0 %v309_v0, %s284_s22 }
  0x85   :  { %v35_v37 = vpop.permute.xlu1 %34  ;;  %v26_v38 = vpop.permute.xlu0 %25 }
  0x89   :  { %v69_v39 = vpop.permute.xlu0 %68  ;;  %v37_v41 = vpop.permute.xlu1 %36 }
  0x8a   :  { %v39_v60 = vsel %vm38_vm7, %v35_v37, %v37_v41  ;;  %v40_v61 = vsel %vm38_vm7, %v37_v41, %v35_v37 }
  0x8d   :  { %v71_v43 = vpop.permute.xlu1 %70  ;;  %v28_v44 = vpop.permute.xlu0 %27 }
  0x8e   :  { %v32_v53 = vsel %vm31_vm6, %v26_v38, %v28_v44  ;;  %v33_v54 = vsel %vm31_vm6, %v28_v44, %v26_v38  ;;  %v73_v55 = vsel %vm72_vm8, %v69_v39, %v71_v43  ;;  %v74_v56 = vsel %vm72_vm8, %v71_v43, %v69_v39 }
  0x8f   :  { %v110_v1 = vadd.f32 %v39_v60, %v33_v54  ;;  %v111_v2 = vadd.f32 %v40_v61, %v32_v53 }
  0x91   :  { %v78_v47 = vpop.permute.xlu1 %77  ;;  %v76_v48 = vpop.permute.xlu0 %75 }
  0x92   :  { %v80_v51 = vsel %vm79_vm5, %v76_v48, %v78_v47  ;;  %v81_v52 = vsel %vm79_vm5, %v78_v47, %v76_v48 }
  0x93   :  { %v86_v62 = vsel %vm337_vm9, %v73_v55, %v81_v52  ;;  %v87_v63 = vsel %vm341_vm10, %v74_v56, %v80_v51 }
  0x94   :  { %v112_v3 = vadd.f32 %v110_v1, %v86_v62  ;;  %v113_v4 = vadd.f32 %v111_v2, %v87_v63 }
  0x95   :  { %v93_v57 = vpop.permute.xlu1 %92  ;;  %v91_v58 = vpop.permute.xlu0 %90 }
  0x96   :  { %v95_v0 = vsel %vm94_vm11, %v91_v58, %v93_v57  ;;  %v96_v8 = vsel %vm94_vm11, %v93_v57, %v91_v58 }
  0x99   :  { %v100_v5 = vpop.permute.xlu1 %99  ;;  %v98_v7 = vpop.permute.xlu0 %97 }
  0x9a   :  { %v102_v9 = vsel %vm101_vm12, %v98_v7, %v100_v5  ;;  %v103_v10 = vsel %vm101_vm12, %v100_v5, %v98_v7 }
  0x9b   :  { %v108_v11 = vsel %vm88_vm13, %v96_v8, %v102_v9  ;;  %v109_v12 = vsel %vm89_vm14, %v95_v0, %v103_v10 }
  0x9c   :  { %v114_v13 = vadd.f32 %v112_v3, %v108_v11  ;;  %v115_v14 = vadd.f32 %v113_v4, %v109_v12 }
  0x9e   :  { %v120_v17 = vsub.f32 %v114_v13, %v116_v59  ;;  %v121_v18 = vsub.f32 %v115_v14, %v118_v6 }
  0xa0   :  { %v181_v19 = vmul.f32 %v146_v16, %v120_v17  ;;  %v182_v20 = vmul.f32 %v146_v16, %v121_v18 }
  0xa2   :  { %v196_v21 = vadd.f32 %v332_v35, %v181_v19  ;;  %v197_v22 = vadd.f32 %v195_v36, %v182_v20 }
  0xa4   :  { %v200_v23 = vcombine.low %v196_v21, %v197_v22 }
  0xa6   :  { %202 = vst [vmem:[#allocation5] sm:$0xff] %v200_v23 }
  0xa7   :  { %263 = shalt.err (!%p260_p12)
}
  0xa8   :  { %s264_s28 = scalar_lea.hbm %s366_s1, 128 }
  0xa9   :  { %p265_p13 = scmp.ne.s32.totalorder %s366_s1, %s264_s28  ;;  %p268_p0 = scmp.lt.u32.totalorder %s264_s28, %s366_s1 }
  0xab   :  { %p270_p1 = pnand %p268_p0, %p265_p13 }
  0xad   :  { %273 = shalt.err (!%p270_p1)
}
  0xae   :  { %212 = dma.vmem_to_hbm [thread:$0]  %s210_s24, 128, %s366_s1, [#allocation4]  }
  0xaf   :  { %276 = dma.done.wait [#allocation4], 128  }
  0xb0   :  { %277 = vsyncadd [#allocation4], 4294967168 }
  0xb1   :  { %216 = vsyncpa [#allocation3], 1 }
  0xb2   :  { %217 = vsyncpa [#allocation4], 1 }

</bundles_post_ra>
